<compile_context>
chip_gen: v7x
topology: tpu7x:2x2x1
jax: 0.10.0
libtpu: 0.0.40
codegen_flags: <defaults>
</compile_context>

<pallas_src>
import functools

import jax
import jax.numpy as jnp
from jax import lax
from jax.experimental import pallas as pl
from jax.experimental.pallas import tpu as pltpu


# ---------------------------------------------------------------------------
# Per-generation tiling / VMEM configuration
# ---------------------------------------------------------------------------

def _chip_generation():
    try:
        kind = jax.devices()[0].device_kind.lower()
    except Exception:
        return "unknown"
    for tag, gen in (("v7", "v7x"), ("v6", "v6e"), ("v5", "v5e")):
        if tag in kind:
            return gen
    return "unknown"


_GEN = _chip_generation()

# projection (tm, tn, tk)
_PROJ_TILES = {"v7x": (512, 512, 256), "v6e": (512, 512, 512),
               "v5e": (512, 512, 256), "unknown": (256, 256, 256)}[_GEN]
# attention (block_q, block_kv)
_ATTN_BLOCKS = {"v7x": (256, 512), "v6e": (256, 512),
                "v5e": (256, 256), "unknown": (256, 256)}[_GEN]
# scoped-VMEM budget (v7x has only 64 MiB physical VMEM -> keep headroom)
_VMEM_LIMIT = {"v7x": 48 * 2**20, "v6e": 96 * 2**20,
               "v5e": 64 * 2**20, "unknown": 32 * 2**20}[_GEN]


def _pick_tile(dim: int, target: int, align: int) -> int:
    """Largest divisor of `dim` that is <= target and a multiple of `align`.

    Falls back to the full dimension (always a legal block) only when no
    aligned divisor exists, so tuned tiles stay in effect for odd shapes
    without blowing the VMEM budget.
    """
    target = min(dim, target)
    for t in range(target, align - 1, -1):
        if dim % t == 0 and t % align == 0:
            return t
    return dim


# ---------------------------------------------------------------------------
# Tiled projection kernels (c_attn with bias, c_proj without bias)
# ---------------------------------------------------------------------------

def _matmul_kernel(x_ref, w_ref, o_ref, acc_ref):
    @pl.when(pl.program_id(2) == 0)
    def _init():
        acc_ref[...] = jnp.zeros_like(acc_ref)

    acc_ref[...] += jnp.dot(x_ref[...], w_ref[...],
                            preferred_element_type=jnp.float32)

    @pl.when(pl.program_id(2) == pl.num_programs(2) - 1)
    def _finalize():
        o_ref[...] = acc_ref[...].astype(o_ref.dtype)


def _matmul_bias_kernel(x_ref, w_ref, b_ref, o_ref, acc_ref):
    @pl.when(pl.program_id(2) == 0)
    def _init():
        acc_ref[...] = jnp.zeros_like(acc_ref)

    acc_ref[...] += jnp.dot(x_ref[...], w_ref[...],
                            preferred_element_type=jnp.float32)

    @pl.when(pl.program_id(2) == pl.num_programs(2) - 1)
    def _finalize():
        o_ref[...] = (acc_ref[...] + b_ref[...].astype(jnp.float32)
                      ).astype(o_ref.dtype)


def linear(x, w_t, bias=None, *, tiles=None):
    """x:(M,K) @ w_t:(K,N) [+ bias:(N,)] with tiled, pipelined MXU matmul."""
    M, K = x.shape
    K2, N = w_t.shape
    assert K == K2
    tm0, tn0, tk0 = tiles if tiles is not None else _PROJ_TILES
    tm = _pick_tile(M, tm0, 8)
    tn = _pick_tile(N, tn0, 128)
    tk = _pick_tile(K, tk0, 128)
    grid = (M // tm, N // tn, K // tk)

    x_spec = pl.BlockSpec((tm, tk), lambda i, j, k: (i, k))
    w_spec = pl.BlockSpec((tk, tn), lambda i, j, k: (k, j))
    o_spec = pl.BlockSpec((tm, tn), lambda i, j, k: (i, j))
    cp = pltpu.CompilerParams(
        dimension_semantics=("parallel", "parallel", "arbitrary"),
        vmem_limit_bytes=_VMEM_LIMIT)
    scratch = [pltpu.VMEM((tm, tn), jnp.float32)]

    if bias is None:
        return pl.pallas_call(
            _matmul_kernel,
            grid=grid,
            in_specs=[x_spec, w_spec],
            out_specs=o_spec,
            out_shape=jax.ShapeDtypeStruct((M, N), x.dtype),
            scratch_shapes=scratch,
            compiler_params=cp,
        )(x, w_t)

    b_spec = pl.BlockSpec((1, tn), lambda i, j, k: (0, j))
    return pl.pallas_call(
        _matmul_bias_kernel,
        grid=grid,
        in_specs=[x_spec, w_spec, b_spec],
        out_specs=o_spec,
        out_shape=jax.ShapeDtypeStruct((M, N), x.dtype),
        scratch_shapes=scratch,
        compiler_params=cp,
    )(x, w_t, bias.reshape(1, N))


# ---------------------------------------------------------------------------
# Flash (online-softmax) varlen causal attention with fused rotary
# ---------------------------------------------------------------------------

def _flash_attn_kernel(kv_lo_ref, segq_ref, segk_ref, q_ref, k_ref, v_ref,
                       csq_ref, csk_ref, o_ref, m_sc, l_sc, acc_sc,
                       *, scale, head_size, block_q, block_kv):
    qi = pl.program_id(1)
    kv = pl.program_id(2)
    half = head_size // 2

    @pl.when(kv == 0)
    def _init():
        m_sc[...] = jnp.full_like(m_sc, -jnp.inf)
        l_sc[...] = jnp.zeros_like(l_sc)
        acc_sc[...] = jnp.zeros_like(acc_sc)

    q_start = qi * block_q
    kv_start = kv * block_kv

    causal_live = kv_start <= q_start + (block_q - 1)
    seg_live = kv >= kv_lo_ref[qi]          # first kv block with this q's segment

    @pl.when(causal_live & seg_live)
    def _compute():
        # fused rotary (GPT-NeoX): x*[cos|cos] + roll(x, half)*[-sin|sin]
        cosq = csq_ref[:, pl.ds(0, head_size)]
        sinq = csq_ref[:, pl.ds(head_size, head_size)]
        cosk = csk_ref[:, pl.ds(0, head_size)]
        sink = csk_ref[:, pl.ds(head_size, head_size)]
        q = q_ref[...]
        k = k_ref[...]
        q = q * cosq + pltpu.roll(q, shift=half, axis=1) * sinq
        k = k * cosk + pltpu.roll(k, shift=half, axis=1) * sink

        # QK^T on the MXU, contracting the head dim of both operands.
        s = lax.dot_general(q, k, (((1,), (1,)), ((), ())),
                            preferred_element_type=jnp.float32) * scale

        # Causal + same-segment (varlen) mask, built in-kernel.
        row = q_start + lax.broadcasted_iota(jnp.int32, (block_q, block_kv), 0)
        col = kv_start + lax.broadcasted_iota(jnp.int32, (block_q, block_kv), 1)
        mask = (row >= col) & (segq_ref[...] == segk_ref[...])
        s = jnp.where(mask, s, -1e30)

        m_prev = m_sc[...]
        m_new = jnp.maximum(m_prev, jnp.max(s, axis=-1, keepdims=True))
        alpha = jnp.exp(m_prev - m_new)
        p = jnp.exp(s - m_new)
        p = jnp.where(mask, p, 0.0)   # all-masked rows never pollute l / acc
        l_sc[...] = alpha * l_sc[...] + jnp.sum(p, axis=-1, keepdims=True)
        acc_sc[...] = alpha * acc_sc[...] + jnp.dot(
            p.astype(v_ref.dtype), v_ref[...],
            preferred_element_type=jnp.float32)
        m_sc[...] = m_new

    @pl.when(kv == pl.num_programs(2) - 1)
    def _finalize():
        o_ref[...] = (acc_sc[...] * pl.reciprocal(l_sc[...], approx=True)
                      ).astype(o_ref.dtype)


def flash_varlen_attention(qkv, cos_sin, seg_ids, num_heads, head_size, scale,
                           *, block_q=None, block_kv=None):
    """qkv: (T, 3*num_heads*head_size) fused slab; cos_sin: (T, 2*head_size)."""
    T = qkv.shape[0]
    P = num_heads * head_size
    bq0, bkv0 = _ATTN_BLOCKS
    tq = _pick_tile(T, block_q or bq0, 8)
    tkv = _pick_tile(T, block_kv or bkv0, 128)
    nq, nkv = T // tq, T // tkv
    grid = (num_heads, nq, nkv)

    seg_q = seg_ids.reshape(T, 1)
    seg_k = seg_ids.reshape(1, T)

    # First kv block (per q block) that can contain keys of the q block's first
    # segment: clamps K/V DMAs from below and gates the compute guard so fully
    # masked cross-segment blocks below the diagonal are never touched.
    kseg_last = seg_ids.reshape(nkv, tkv)[:, -1]
    qseg_first = seg_ids.reshape(nq, tq)[:, 0]
    kv_lo = jnp.searchsorted(kseg_last, qseg_first, side="left").astype(jnp.int32)

    def kv_block(i, j, lo_ref):
        hi = (i * tq + tq - 1) // tkv          # causal diagonal block
        return jnp.clip(j, lo_ref[i], hi)      # skipped steps reuse resident block

    q_spec = pl.BlockSpec((tq, head_size), lambda h, i, j, lo: (i, h))
    k_spec = pl.BlockSpec((tkv, head_size),
                          lambda h, i, j, lo: (kv_block(i, j, lo), num_heads + h))
    v_spec = pl.BlockSpec((tkv, head_size),
                          lambda h, i, j, lo: (kv_block(i, j, lo), 2 * num_heads + h))
    csq_spec = pl.BlockSpec((tq, 2 * head_size), lambda h, i, j, lo: (i, 0))
    csk_spec = pl.BlockSpec((tkv, 2 * head_size),
                            lambda h, i, j, lo: (kv_block(i, j, lo), 0))
    segq_spec = pl.BlockSpec((tq, 1), lambda h, i, j, lo: (i, 0))
    segk_spec = pl.BlockSpec((1, tkv), lambda h, i, j, lo: (0, kv_block(i, j, lo)))

    grid_spec = pltpu.PrefetchScalarGridSpec(
        num_scalar_prefetch=1,
        grid=grid,
        in_specs=[segq_spec, segk_spec, q_spec, k_spec, v_spec,
                  csq_spec, csk_spec],
        out_specs=pl.BlockSpec((tq, head_size), lambda h, i, j, lo: (i, h)),
        scratch_shapes=[pltpu.VMEM((tq, 1), jnp.float32),          # running max
                        pltpu.VMEM((tq, 1), jnp.float32),          # running denom
                        pltpu.VMEM((tq, head_size), jnp.float32)])  # accumulator

    return pl.pallas_call(
        functools.partial(_flash_attn_kernel, scale=scale,
                          head_size=head_size, block_q=tq, block_kv=tkv),
        grid_spec=grid_spec,
        out_shape=jax.ShapeDtypeStruct((T, P), qkv.dtype),
        compiler_params=pltpu.CompilerParams(
            dimension_semantics=("parallel", "parallel", "arbitrary"),
            vmem_limit_bytes=_VMEM_LIMIT),
    )(kv_lo, seg_q, seg_k, qkv, qkv, qkv, cos_sin, cos_sin)


# ---------------------------------------------------------------------------
# KV-cache scatter (paged_attn.reshape_and_cache) with fused K rotary:
# row-block grid + manual multi-outstanding DMAs into the aliased HBM caches.
# ---------------------------------------------------------------------------

def _cache_write_kernel(slots_ref, k_ref, v_ref, cs_ref, kc_in, vc_in,
                        kc_hbm, vc_hbm, kbuf, vbuf, sems,
                        *, num_kv_heads, head_size, block_rows, max_outstanding):
    del kc_in, vc_in                      # aliased to kc_hbm / vc_hbm
    half = head_size // 2
    cos = cs_ref[:, pl.ds(0, head_size)]
    sin = cs_ref[:, pl.ds(head_size, head_size)]

    # Rotary on K per KV head (static unrolled loop), staged in cache dtype.
    for h in range(num_kv_heads):
        sl = pl.ds(h * head_size, head_size)
        kh = k_ref[:, sl]
        kbuf[:, sl] = (kh * cos + pltpu.roll(kh, shift=half, axis=1) * sin
                       ).astype(kbuf.dtype)
    vbuf[...] = v_ref[...].astype(vbuf.dtype)

    base = pl.program_id(0) * block_rows

    def _wait(s):
        # Dummy src/dst of the right shape: wait only decrements the semaphore.
        pltpu.make_async_copy(kbuf.at[pl.ds(0, 1)], kc_hbm.at[pl.ds(0, 1)],
                              sems.at[s, 0]).wait()
        pltpu.make_async_copy(vbuf.at[pl.ds(0, 1)], vc_hbm.at[pl.ds(0, 1)],
                              sems.at[s, 1]).wait()

    def _issue(r, carry):
        s = r % max_outstanding

        @pl.when(r >= max_outstanding)
        def _():
            _wait(s)                       # throttle: free this semaphore slot

        slot = slots_ref[base + r]
        pltpu.make_async_copy(kbuf.at[pl.ds(r, 1)],
                              kc_hbm.at[pl.ds(slot, 1)], sems.at[s, 0]).start()
        pltpu.make_async_copy(vbuf.at[pl.ds(r, 1)],
                              vc_hbm.at[pl.ds(slot, 1)], sems.at[s, 1]).start()
        return carry

    lax.fori_loop(0, block_rows, _issue, 0)

    def _drain(s, carry):
        _wait(s)
        return carry

    lax.fori_loop(0, min(block_rows, max_outstanding), _drain, 0)


def write_kv_cache(qkv, cos_sin, slots, key_cache, value_cache,
                   num_heads, head_size, *, block_rows=128, max_outstanding=8):
    """Scatter rotated K and raw V rows (read from the qkv slab) into the caches."""
    T = qkv.shape[0]
    P = num_heads * head_size              # num_key_value_heads == num_heads
    num_slots = key_cache.shape[0]
    tb = _pick_tile(T, block_rows, 8)
    max_outstanding = max(1, min(max_outstanding, tb))

    kc_flat = key_cache.reshape(num_slots, P)
    vc_flat = value_cache.reshape(num_slots, P)

    k_spec = pl.BlockSpec((tb, P), lambda i, slots: (i, 1))   # K section of slab
    v_spec = pl.BlockSpec((tb, P), lambda i, slots: (i, 2))   # V section of slab
    cs_spec = pl.BlockSpec((tb, 2 * head_size), lambda i, slots: (i, 0))
    any_spec = pl.BlockSpec(memory_space=pl.ANY)

    grid_spec = pltpu.PrefetchScalarGridSpec(
        num_scalar_prefetch=1,
        grid=(T // tb,),
        in_specs=[k_spec, v_spec, cs_spec, any_spec, any_spec],
        out_specs=[any_spec, any_spec],
        scratch_shapes=[
            pltpu.VMEM((tb, P), key_cache.dtype),     # rotated K staging
            pltpu.VMEM((tb, P), value_cache.dtype),   # V staging (dtype cast)
            pltpu.SemaphoreType.DMA((max_outstanding, 2)),
        ])

    kc_new, vc_new = pl.pallas_call(
        functools.partial(_cache_write_kernel, num_kv_heads=num_heads,
                          head_size=head_size, block_rows=tb,
                          max_outstanding=max_outstanding),
        grid_spec=grid_spec,
        out_shape=(jax.ShapeDtypeStruct(kc_flat.shape, kc_flat.dtype),
                   jax.ShapeDtypeStruct(vc_flat.shape, vc_flat.dtype)),
        # flat args: (slots, qkv, qkv, cos_sin, kc_flat, vc_flat)
        input_output_aliases={4: 0, 5: 1},
        compiler_params=pltpu.CompilerParams(
            dimension_semantics=("arbitrary",),
            vmem_limit_bytes=_VMEM_LIMIT,
            has_side_effects=True),
    )(slots, qkv, qkv, cos_sin, kc_flat, vc_flat)

    return (kc_new.reshape(key_cache.shape), vc_new.reshape(value_cache.shape))


# ---------------------------------------------------------------------------
# Module forward (prefill path of FlashQwenAttention, single shard, no LoRA)
# ---------------------------------------------------------------------------

def flash_qwen_attention_forward(params, hidden_states, cos, sin,
                                 cu_seqlen_prefill, kv_cache, slots,
                                 num_heads, head_size):
    T, H = hidden_states.shape
    P = num_heads * head_size
    scale = head_size ** -0.5
    # Per-head column slicing via BlockSpec assumes head_size is lane-aligned
    # (true for real Qwen: head_size == 128).
    assert head_size % 128 == 0 and head_size % 2 == 0

    act_dtype = hidden_states.dtype
    w_qkv_t = params["c_attn_weight"].astype(act_dtype).T      # (H, 3P)
    b_qkv = params["c_attn_bias"].astype(act_dtype)            # (3P,)
    w_proj_t = params["c_proj_weight"].astype(act_dtype).T     # (P, H)

    # c_attn: fused QKV projection (tiled/pipelined Pallas matmul, f32 accum)
    qkv = linear(hidden_states, w_qkv_t, b_qkv)                # (T, 3P)

    # Packed, sign-folded rotary table [cos|cos|-sin|sin] in the activation dtype.
    cos_sin = jnp.concatenate([cos, cos, -sin, sin], axis=-1).astype(act_dtype)

    # segment ids (one per prefill sequence) for the varlen mask
    seg_ids = jnp.searchsorted(
        cu_seqlen_prefill[1:],
        jnp.arange(T, dtype=cu_seqlen_prefill.dtype),
        side="right").astype(jnp.int32)

    # paged_attn.reshape_and_cache: K rotary fused, V read from the slab,
    # in-place scatter into the slot caches via manual multi-outstanding DMAs.
    key_cache, value_cache = write_kv_cache(
        qkv, cos_sin, slots, kv_cache[0], kv_cache[1], num_heads, head_size)

    # varlen causal flash attention with fused rotary (online softmax,
    # in-kernel causal+segment mask, causally/segment-clamped K/V streaming).
    attn = flash_varlen_attention(qkv, cos_sin, seg_ids, num_heads, head_size,
                                  scale)                        # (T, P)

    # TODO(synk): decode path (paged_attn.single_query_cached_kv_attention),
    # the LoRA adapter path and the tensor-parallel all-reduce are not
    # implemented; this covers `cu_seqlen_prefill is not None` on one shard.

    # c_proj: output projection, no bias
    out = linear(attn, w_proj_t)                                # (T, H)
    return out, (key_cache, value_cache)


# ---------------------------------------------------------------------------
# Pure-JAX reference (high precision) for validation
# ---------------------------------------------------------------------------

def reference_forward(params, hidden_states, cos, sin, cu_seqlen_prefill,
                      num_heads, head_size):
    T, H = hidden_states.shape
    P = num_heads * head_size
    scale = head_size ** -0.5
    hp = jax.lax.Precision.HIGHEST

    qkv = (jnp.dot(hidden_states, params["c_attn_weight"].T, precision=hp)
           + params["c_attn_bias"])
    query = qkv[:, :P].reshape(T, num_heads, head_size)
    key = qkv[:, P:2 * P].reshape(T, num_heads, head_size)
    value = qkv[:, 2 * P:].reshape(T, num_heads, head_size)

    def rot(x):
        half = head_size // 2
        x1, x2 = x[..., :half], x[..., half:]
        c = cos[:, None, :]
        s = sin[:, None, :]
        return jnp.concatenate([x1 * c - x2 * s, x2 * c + x1 * s], axis=-1)

    q = rot(query)
    k = rot(key)
    seg = jnp.searchsorted(cu_seqlen_prefill[1:], jnp.arange(T), side="right")
    pos = jnp.arange(T)
    allowed = (seg[:, None] == seg[None, :]) & (pos[None, :] <= pos[:, None])
    s = jnp.einsum("qhd,khd->hqk", q, k, precision=hp) * scale
    s = jnp.where(allowed[None], s, -jnp.inf)
    p = jax.nn.softmax(s, axis=-1)
    o = jnp.einsum("hqk,khd->qhd", p, value, precision=hp).reshape(T, P)
    out = jnp.dot(o, params["c_proj_weight"].T, precision=hp)
    return out, q.reshape(T, P), k.reshape(T, P), value.reshape(T, P)


# ---------------------------------------------------------------------------
# main
# ---------------------------------------------------------------------------

if __name__ == "__main__":
    # small Qwen-like config (head_size=128 matches real Qwen heads)
    hidden_size = 256
    num_heads = 2
    head_size = hidden_size // num_heads      # 128; kv_channels == head_size
    P = num_heads * head_size                 # projection_size
    rope_theta = 10000.0
    seq_lens = [256, 256, 192, 320]           # multi-sequence prefill batch
    T = sum(seq_lens)                         # 1024
    num_slots = 2048
    act_dtype = jnp.bfloat16                  # bf16 activations, f32 accumulators

    key = jax.random.PRNGKey(0)
    k0, k1, k2, k3, k4, k5 = jax.random.split(key, 6)
    params = {
        "c_attn_weight": 0.03 * jax.random.normal(k0, (3 * P, hidden_size),
                                                  jnp.float32),
        "c_attn_bias": 0.03 * jax.random.normal(k1, (3 * P,), jnp.float32),
        "c_proj_weight": 0.03 * jax.random.normal(k2, (hidden_size, P),
                                                  jnp.float32),
    }
    hidden_states = jax.random.normal(k3, (T, hidden_size), jnp.float32)

    # rotary cos/sin as produced by PositionRotaryEmbedding for these positions
    positions = jnp.concatenate(
        [jnp.arange(l, dtype=jnp.float32) for l in seq_lens])
    inv_freq = 1.0 / (rope_theta ** (
        jnp.arange(0, head_size, 2, dtype=jnp.float32) / head_size))
    angles = positions[:, None] * inv_freq[None, :]          # (T, head_size//2)
    cos = jnp.cos(angles)
    sin = jnp.sin(angles)

    # cu_seqlen_prefill, slots, kv cache
    cu_list = [0]
    for l in seq_lens:
        cu_list.append(cu_list[-1] + l)
    cu_seqlen_prefill = jnp.array(cu_list, dtype=jnp.int32)
    slots = ((jnp.arange(T, dtype=jnp.int32) * 3 + 7) % num_slots).astype(jnp.int32)
    kv_cache = (
        jax.random.normal(k4, (num_slots, num_heads, head_size)).astype(act_dtype),
        jax.random.normal(k5, (num_slots, num_heads, head_size)).astype(act_dtype),
    )

    out, (key_cache, value_cache) = flash_qwen_attention_forward(
        params, hidden_states.astype(act_dtype), cos, sin, cu_seqlen_prefill,
        kv_cache, slots, num_heads, head_size)
    jax.block_until_ready((out, key_cache, value_cache))

    ref_out, ref_q, ref_k, ref_v = reference_forward(
        params, hidden_states, cos, sin, cu_seqlen_prefill, num_heads, head_size)

    assert out.shape == (T, hidden_size)
    assert out.dtype == act_dtype
    assert jnp.allclose(out.astype(jnp.float32), ref_out,
                        atol=2e-2, rtol=2e-2), "output mismatch"
    assert jnp.allclose(key_cache[slots].reshape(T, P).astype(jnp.float32),
                        ref_k, atol=2e-2, rtol=2e-2), "key cache mismatch"
    assert jnp.allclose(value_cache[slots].reshape(T, P).astype(jnp.float32),
                        ref_v, atol=2e-2, rtol=2e-2), "value cache mismatch"

    print("KERNEL_OK")
</pallas_src>

<mosaic_0001>
module attributes {stable_mosaic.version = 11 : i64} {
  func.func @_matmul_bias_kernel(%arg0: i32, %arg1: i32, %arg2: i32, %arg3: memref<256x256xbf16, #tpu.memory_space<vmem>>, %arg4: memref<256x256xbf16, #tpu.memory_space<vmem>>, %arg5: memref<1x256xbf16, #tpu.memory_space<vmem>>, %arg6: memref<256x256xbf16, #tpu.memory_space<vmem>>, %arg7: memref<256x256xf32, #tpu.memory_space<vmem>>) attributes {dimension_semantics = [#tpu.dimension_semantics<parallel>, #tpu.dimension_semantics<parallel>, #tpu.dimension_semantics<arbitrary>], iteration_bounds = array<i64: 4, 3, 1>, scalar_prefetch = 0 : i64, scratch_operands = 1 : i64, tpu.core_type = #tpu.core_type<tc>, window_params = [{transform_indices = @transform_0, window_bounds = array<i64: 256, 256>}, {transform_indices = @transform_1, window_bounds = array<i64: 256, 256>}, {transform_indices = @transform_2, window_bounds = array<i64: 1, 256>}, {transform_indices = @transform_3, window_bounds = array<i64: 256, 256>}]} {
    %c0_i32 = arith.constant 0 : i32
    %0 = arith.cmpi eq, %arg2, %c0_i32 : i32
    %1 = arith.extui %0 : i1 to i32
    %c0_i32_0 = arith.constant 0 : i32
    %2 = arith.cmpi ne, %1, %c0_i32_0 : i32
    scf.if %2 {
      %cst_10 = arith.constant 0.000000e+00 : f32
      %12 = vector.broadcast %cst_10 : f32 to vector<256x256xf32>
      %c0_11 = arith.constant 0 : index
      %c0_12 = arith.constant 0 : index
      %13 = vector.load %arg7[%c0_11, %c0_12] : memref<256x256xf32, #tpu.memory_space<vmem>>, vector<256x256xf32>
      tpu.vector_store %arg7[%c0_11, %c0_12], %12 {strides = array<i32>} : memref<256x256xf32, #tpu.memory_space<vmem>>, vector<256x256xf32>,
    } else {
    }
    %c0 = arith.constant 0 : index
    %c0_1 = arith.constant 0 : index
    %3 = vector.load %arg7[%c0, %c0_1] : memref<256x256xf32, #tpu.memory_space<vmem>>, vector<256x256xf32>
    %c0_2 = arith.constant 0 : index
    %c0_3 = arith.constant 0 : index
    %4 = vector.load %arg3[%c0_2, %c0_3] : memref<256x256xbf16, #tpu.memory_space<vmem>>, vector<256x256xbf16>
    %c0_4 = arith.constant 0 : index
    %c0_5 = arith.constant 0 : index
    %5 = vector.load %arg4[%c0_4, %c0_5] : memref<256x256xbf16, #tpu.memory_space<vmem>>, vector<256x256xbf16>
    %cst = arith.constant dense<0.000000e+00> : vector<256x256xf32>
    %6 = tpu.matmul %4, %5, %cst {dimension_numbers = #tpu.dot_dimension_numbers<[1], [0], [0], [1], [0, 0, 1, 1], [], []>} : vector<256x256xbf16>, vector<256x256xbf16>, vector<256x256xf32> -> vector<256x256xf32>
    %7 = arith.addf %3, %6 : vector<256x256xf32>
    %c0_6 = arith.constant 0 : index
    %c0_7 = arith.constant 0 : index
    %8 = vector.load %arg7[%c0_6, %c0_7] : memref<256x256xf32, #tpu.memory_space<vmem>>, vector<256x256xf32>
    tpu.vector_store %arg7[%c0_6, %c0_7], %7 {strides = array<i32>} : memref<256x256xf32, #tpu.memory_space<vmem>>, vector<256x256xf32>,
    %c0_i32_8 = arith.constant 0 : i32
    %9 = arith.cmpi eq, %arg2, %c0_i32_8 : i32
    %10 = arith.extui %9 : i1 to i32
    %c0_i32_9 = arith.constant 0 : i32
    %11 = arith.cmpi ne, %10, %c0_i32_9 : i32
    scf.if %11 {
      %c0_10 = arith.constant 0 : index
      %c0_11 = arith.constant 0 : index
      %12 = vector.load %arg7[%c0_10, %c0_11] : memref<256x256xf32, #tpu.memory_space<vmem>>, vector<256x256xf32>
      %c0_12 = arith.constant 0 : index
      %c0_13 = arith.constant 0 : index
      %13 = vector.load %arg5[%c0_12, %c0_13] : memref<1x256xbf16, #tpu.memory_space<vmem>>, vector<1x256xbf16>
      %14 = arith.extf %13 : vector<1x256xbf16> to vector<1x256xf32>
      %15 = vector.broadcast %14 : vector<1x256xf32> to vector<256x256xf32>
      %16 = arith.addf %12, %15 : vector<256x256xf32>
      %17 = arith.truncf %16 : vector<256x256xf32> to vector<256x256xbf16>
      %c0_14 = arith.constant 0 : index
      %c0_15 = arith.constant 0 : index
      %18 = vector.load %arg6[%c0_14, %c0_15] : memref<256x256xbf16, #tpu.memory_space<vmem>>, vector<256x256xbf16>
      tpu.vector_store %arg6[%c0_14, %c0_15], %17 {strides = array<i32>} : memref<256x256xbf16, #tpu.memory_space<vmem>>, vector<256x256xbf16>,
    } else {
    }
    return
  }
  func.func @transform_0(%arg0: i32, %arg1: i32, %arg2: i32) -> (i32, i32) {
    %c0_i32 = arith.constant 0 : i32
    return %arg0, %arg2 : i32, i32
  }
  func.func @transform_1(%arg0: i32, %arg1: i32, %arg2: i32) -> (i32, i32) {
    %c0_i32 = arith.constant 0 : i32
    return %arg2, %arg1 : i32, i32
  }
  func.func @transform_2(%arg0: i32, %arg1: i32, %arg2: i32) -> (i32, i32) {
    %c0_i32 = arith.constant 0 : i32
    %c0_i32_0 = arith.constant 0 : i32
    return %c0_i32, %arg1 : i32, i32
  }
  func.func @transform_3(%arg0: i32, %arg1: i32, %arg2: i32) -> (i32, i32) {
    %c0_i32 = arith.constant 0 : i32
    return %arg0, %arg1 : i32, i32
  }
}

</mosaic_0001>

<bundles_post_ra>
// kernel: tpu_custom_call.1
= control target key start
LH: loop header
LB: loop body
LE: loop exit
PB: predicated region body
PF: predicated region fallthrough
CT: control target
= control target key end

     0   :  { %s2939_s0 = inlined_call_operand.hbm [shape: bf16[1024,256], index: 0, kind: input, shape index: {}]   ;;  %s2940_s1 = inlined_call_operand.hbm [shape: bf16[256,768], index: 1, kind: input, shape index: {}]   ;;  %s2941_s2 = inlined_call_operand.hbm [shape: bf16[1,768], index: 2, kind: input, shape index: {}]   ;;  %s2942_s3 = inlined_call_operand.hbm [shape: bf16[1024,768], index: 3, kind: output, shape index: {}]  }
   0x1   :  { %2960 = sst [smem:[#allocation25_spill]] %s2940_s1 }
   0x2   :  { %2961 = sst [smem:[#allocation26_spill]] %s2942_s3 }
   0x3   :  { %8 = vsyncpa [#allocation4], 0 }
   0x4   :  { %10 = vsyncpa [#allocation4 + $0x1], 0 }
   0x5   :  { %11 = vsyncpa [#allocation7], 0 }
   0x6   :  { %13 = vsyncpa [#allocation7 + $0x1], 0 }
   0x7   :  { %14 = vsyncpa [#allocation5], 0 }
   0x8   :  { %16 = vsyncpa [#allocation5 + $0x1], 0  ;;  %s2372_s12 = smov 0   ;;  %s2374_s13 = smov 0  }
   0x9   :  { %s2376_s14 = smov 0   ;;  %s2378_s15 = smov 0  }
   0xa   :  { %s2380_s16 = smov 0   ;;  %s2382_s17 = smov 0  }
   0xb   :  { %s2384_s18 = smov 0   ;;  %s2386_s19 = smov 0  }
   0xc   :  { %s2388_s20 = smov 0   ;;  %s2390_s21 = smov 0  }
   0xd   :  { %s2392_s22 = smov 0   ;;  %s2394_s23 = smov 0  }
   0xe   :  { %s2396_s24 = smov 0   ;;  %s2398_s25 = smov 0  }
   0xf LB: > { %2962 = sst [smem:[#allocation13_spill]] %s2296_s14  ;;  %s37_s26 = sadd.s32 1, %s2332_s23  ;;  %s2340_s25 = sphi %s2398_s25, %s22_s25   ;;  %s2336_s24 = sphi %s2396_s24, %s3013_s24   ;;  %s2332_s23 = sphi %s2394_s23, %s3021_s23   ;;  %s2328_s22 = sphi %s2392_s22, %s3011_s22   ;;  %s2324_s21 = sphi %s2390_s21, %s3020_s21   ;;  %s2320_s20 = sphi %s2388_s20, %s3009_s20   ;;  %s2316_s19 = sphi %s2386_s19, %s3019_s19   ;;  %s2312_s18 = sphi %s2384_s18, %s3018_s18   ;;  %s2308_s17 = sphi %s2382_s17, %s3007_s17   ;;  %s2304_s16 = sphi %s2380_s16, %s3017_s16   ;;  %s2300_s15 = sphi %s2378_s15, %s3016_s15   ;;  %s2296_s14 = sphi %s2376_s14, %s3005_s14   ;;  %s2292_s13 = sphi %s2374_s13, %s3015_s13   ;;  %s2288_s12 = sphi %s2372_s12, %s3014_s12  }
  0x10   : > { %2963 = sst [smem:[#allocation14_spill]] %s2308_s17  ;;  %p2945_p0 = scmp.eq.s32.totalorder %s2340_s25, 0 }
  0x11   : > { %2964 = sst [smem:[#allocation15_spill]] %s2320_s20  ;;  %p2446_p1 = scmp.ge.s32.totalorder %s37_s26, 3 }
  0x12   : > { %2965 = sst [smem:[#allocation16_spill]] %s2324_s21  ;;  %p85_p2 = scmp.ne.s32.totalorder %s2308_s17, %s2304_s16 }
  0x13   : > { %2966 = sst [smem:[#allocation17_spill]] %s2328_s22  ;;  %p2944_p4 = scmp.lt.s32.totalorder %s2340_s25, 12 }
  0x14   : > { %2967 = sst [smem:[#allocation18_spill]] %s2332_s23  ;;  %p87_p5 = por %p85_p2, %p2945_p0 }
  0x15   : > { %2968 = sst [smem:[#allocation19_spill]] %s2336_s24  ;;  %s193_s29 = sand.u32 1, %s2340_s25  }
  0x16   : > { %s2943_s30 = sand.u32 1, %s2308_s17   ;;  %s1795_s5 = sshll.u32 %s2332_s23, 7 }
  0x17   : > { %s1679_s4 = sshll.u32 %s2943_s30, 8  ;;  %s2970_s1 = sld [smem:[#allocation25_spill]] }
  0x18   : > { %s197_s9 = scalar_lea.vmem [#allocation6], %s1679_s4  ;;  %p2470_p6 = pnand %p2944_p4, %p87_p5 }
  0x19   : > { %s207_s10 = sshll.u32 %s197_s9, 4  ;;  %s2477_s30 = scalar_lea.sflag [#allocation7], %s193_s29  ;;  %s2474_s10 = int_to_ptr.vmem [resolvable:$true] %s207_s10 }
  0x1a   : > { %p2956_p9 = pneg %p2470_p6 }
  0x1d   : > { %s2466_s8 = scalar_lea.hbm %s2970_s1, %s1795_s5  ;;  %s2105_s7 = scalar_lea.hbm %s2970_s1, 12288 }
  0x1e   : > { %s2100_s5 = scalar_lea.hbm %s2466_s8, 4096  ;;  %p2106_p12 = scmp.lt.u32.totalorder %s2466_s8, %s2970_s1 }
  0x1f   : > { %p2101_p8 = scmp.ne.s32.totalorder %s2466_s8, %s2100_s5  ;;  %p2107_p13 = scmp.lt.u32.totalorder %s2105_s7, %s2100_s5 }
  0x20   : > { %p2109_p5 = scmp.lt.u32.totalorder %s2100_s5, %s2466_s8 }
  0x21   : > { %p2103_p10 = pnand %p2956_p9, %p2101_p8  ;;  %p2108_p2 = por %p2107_p13, %p2106_p12 }
  0x23   : > { %p2104_p11 = pneg %p2103_p10  ;;  %p2110_p4 = por %p2109_p5, %p2108_p2 }
  0x25   : > { %p2111_p3 = pnand %p2110_p4, %p2104_p11 }
  0x27   : > { %2114 = shalt.err (!%p2111_p3)
}
  0x28   : > { %s2115_s29 = scalar_lea.vmem %s2474_s10, 4096  ;;  %s2342_s4 = smov [#allocation6]  }
  0x29   : > { %p2116_p8 = scmp.ne.s32.totalorder %s2474_s10, %s2115_s29  ;;  %s2120_s6 = sshll.u32 %s2342_s4, 4  ;;  %s2121_s6 = int_to_ptr.vmem [resolvable:$false] %s2120_s6 }
  0x2a   : > { %s2122_s28 = scalar_lea.vmem %s2121_s6, 8192  ;;  %p2123_p7 = scmp.lt.s32.totalorder %s2474_s10, %s2121_s6 }
  0x2b   : > { %p2118_p10 = pnand %p2116_p8, %p2956_p9  ;;  %p2124_p12 = scmp.lt.s32.totalorder %s2122_s28, %s2115_s29 }
  0x2d   : > { %p2119_p0 = pneg %p2118_p10  ;;  %p2125_p13 = por %p2124_p12, %p2123_p7 }
  0x2f   : > { %p2126_p2 = pnand %p2125_p13, %p2119_p0 }
  0x31   : > { %2129 = shalt.err (!%p2126_p2)
}
  0x32   : > { %s2343_s5 = smov 384   ;;  %s2946_s7 = smov 128  }
  0x33   : > { %s2947_s9 = smov 8   ;;  %p234_p0 = scmp.lt.s32.totalorder %s2340_s25, 13 }
  0x34   : > { %1876 = dma.hbm_to_vmem [thread:$0]  (!%p2470_p6), %s2466_s8, 4096, %s2474_s10, %s2477_s30, %s2343_s5, %s2946_s7, %s2947_s9  }
  0x35   : > { %p2972_p3 = scmp.ge.s32.totalorder %s2340_s25, 1  ;;  %s2515_s4 = sadd.s32 4294967295, %s2340_s25  }
  0x36   : > { %s1672_s6 = sadd.s32 4294967294, %s2340_s25   ;;  %s3023_s26 = smov (%p2446_p1, %s37_s26), 0 }
  0x37   : > { %p2510_p4 = pnand %p2972_p3, %p234_p0  ;;  %2974 = sst [smem:[#allocation20_spill]] %s3023_s26 }
  0x38   : > { %s41_s28 = sadd.s32 1, %s2336_s24  ;;  %s50_s8 = sadd.s32 1, %s2320_s20 }
  0x39   : > { %s2973_s29 = scalar_select %p2510_p4, 1, 0 }
  0x3a   : > { %s3025_s28 = smov (!%p2446_p1, %s41_s28), %s2336_s24  ;;  %p57_p7 = scmp.ne.s32.totalorder %s2320_s20, %s2316_s19 }
  0x3b   : > { %p63_p11 = scmp.ne.s32.totalorder %s2316_s19, %s2312_s18  ;;  %p43_p5 = scmp.ge.s32.totalorder %s3025_s28, 4 }
  0x3c   : > { %p64_p8 = scmp.eq.s32.totalorder %s2515_s4, 0  ;;  %p2975_p10 = scmp.eq.s32.totalorder %s2340_s25, 0 }
  0x3d   : > { %s74_s5 = ssub.s32 %s2332_s23, %s3023_s26  ;;  %s3027_s28 = smov (%p43_p5, %s3025_s28), 0 }
  0x3e   : > { %p2536_p12 = por %p2975_p10, %p57_p7  ;;  %2977 = sst [smem:[#allocation21_spill]] %s3027_s28 }
  0x3f   : > { %p2544_p1 = por %p64_p8, %p63_p11  ;;  %p76_p13 = scmp.eq.s32.totalorder %s74_s5, 0 }
  0x40   : > { %s45_s18 = ssub.s32 %s2336_s24, %s3027_s28  ;;  %p2979_p2 = scmp.ne.s32.totalorder %s2304_s16, %s2300_s15 }
  0x41   : > { %s2978_s27 = scalar_select %p2544_p1, 1, 0 }
  0x42   : > { %p2553_p0 = por %p2979_p2, %p64_p8  ;;  %p48_p3 = scmp.eq.s32.totalorder %s45_s18, 0 }
  0x43   : > { %s129_s9 = sor.u32 %s74_s5, %s45_s18  ;;  %s2981_s1 = sadd.s32 1, %s2308_s17 }
  0x44   : > { %s2980_s7 = scalar_select %p2553_p0, 1, 0 }
  0x45   : > { %s2560_s26 = scalar_select %p76_p13, %s2308_s17, %s2981_s1  }
  0x46   : > { %s2563_s3 = scalar_select %p48_p3, %s2320_s20, %s50_s8  }
  0x47   : > { %2982 = sst [smem:[#allocation22_spill]] %s2560_s26  ;;  %p130_p7 = scmp.eq.s32.totalorder %s129_s9, 0 }
  0x48   : > { %2983 = sst [smem:[#allocation23_spill]] %s2563_s3  ;;  %s132_s21 = sadd.s32 1, %s2296_s14 }
  0x49   : > { %p142_p11 = scmp.ne.s32.totalorder %s2296_s14, %s2292_s13  ;;  %p143_p5 = scmp.eq.s32.totalorder %s2515_s4, 11 }
  0x4a   : > { %s2570_s15 = scalar_select %p130_p7, %s2296_s14, %s132_s21  }
  0x4b   : > { %p2572_p8 = por %p143_p5, %p142_p11  ;;  %p148_p10 = scmp.ne.s32.totalorder %s2292_s13, %s2288_s12 }
  0x4c   : > { %2984 = sst [smem:[#allocation24_spill]] %s2570_s15  ;;  %p149_p2 = scmp.eq.s32.totalorder %s1672_s6, 11 }
  0x4d   : > { %s2985_s28 = scalar_select %p2572_p8, 1, 0 }
  0x4e   : > { %s169_s1 = sand.u32 1, %s2320_s20   ;;  %p2579_p13 = por %p149_p2, %p148_p10 }
  0x4f   : > { %s1675_s5 = sshll.u32 %s169_s1, 8  ;;  %s1794_s9 = sshll.u32 %s2336_s24, 12 }
  0x50   : > { %s2986_s8 = scalar_select %p2579_p13, 1, 0 }
  0x51   : > { %s173_s18 = scalar_lea.vmem [#allocation3], %s1675_s5  ;;  %s2587_s21 = scalar_lea.hbm %s2939_s0, %s1794_s9 }
  0x52   : > { %s183_s3 = sshll.u32 %s173_s18, 4  ;;  %p2987_p3 = scmp.lt.s32.totalorder %s2340_s25, 12  ;;  %s2589_s3 = int_to_ptr.vmem [resolvable:$true] %s183_s3 }
  0x53   : > { %s2989_s24 = sand.u32 1, %s2308_s17   ;;  %s1796_s22 = sshll.u32 %s2332_s23, 5 }
  0x54   : > { %p2595_p7 = pnand %p2987_p3, %p2536_p12  ;;  %s2601_s5 = sshll.u32 %s2989_s24, 1 }
  0x55   : > { %s2607_s18 = scalar_lea.hbm %s2941_s2, %s1796_s22  ;;  %s2609_s20 = scalar_lea.sflag [#allocation4], %s169_s1 }
  0x56   : > { %s2130_s15 = scalar_lea.hbm %s2587_s21, 4096  ;;  %p2132_p12 = pneg %p2595_p7 }
  0x57   : > { %p2131_p11 = scmp.ne.s32.totalorder %s2587_s21, %s2130_s15  ;;  %s2135_s24 = scalar_lea.hbm %s2939_s0, 16384 }
  0x58   : > { %p2136_p2 = scmp.lt.u32.totalorder %s2587_s21, %s2939_s0  ;;  %p2137_p3 = scmp.lt.u32.totalorder %s2135_s24, %s2130_s15 }
  0x59   : > { %p2133_p5 = pnand %p2132_p12, %p2131_p11  ;;  %p2139_p13 = scmp.lt.u32.totalorder %s2130_s15, %s2587_s21 }
  0x5a   : > { %p2138_p9 = por %p2137_p3, %p2136_p2 }
  0x5b   : > { %p2134_p10 = pneg %p2133_p5 }
  0x5c   : > { %p2140_p8 = por %p2139_p13, %p2138_p9 }
  0x5e   : > { %p2141_p0 = pnand %p2140_p8, %p2134_p10 }
  0x60   : > { %2144 = shalt.err (!%p2141_p0)
}
  0x61   : > { %s2145_s1 = scalar_lea.vmem %s2589_s3, 4096  ;;  %s2346_s17 = smov [#allocation3]  }
  0x62   : > { %p2146_p11 = scmp.ne.s32.totalorder %s2589_s3, %s2145_s1  ;;  %s2150_s22 = sshll.u32 %s2346_s17, 4  ;;  %s2151_s22 = int_to_ptr.vmem [resolvable:$false] %s2150_s22 }
  0x63   : > { %s2152_s14 = scalar_lea.vmem %s2151_s22, 8192  ;;  %p2153_p4 = scmp.lt.s32.totalorder %s2589_s3, %s2151_s22 }
  0x64   : > { %p2148_p5 = pnand %p2146_p11, %p2132_p12  ;;  %p2154_p2 = scmp.lt.s32.totalorder %s2152_s14, %s2145_s1 }
  0x66   : > { %p2149_p1 = pneg %p2148_p5  ;;  %p2155_p3 = por %p2154_p2, %p2153_p4 }
  0x68   : > { %p2156_p9 = pnand %p2155_p3, %p2149_p1 }
  0x6a   : > { %2159 = shalt.err (!%p2156_p9)
}
  0x6b   : > { %s2990_s23 = smov 8   ;;  %s2991_s15 = smov 128  }
  0x6c   : > { %1873 = dma.hbm_to_vmem [thread:$0]  (!%p2595_p7), %s2587_s21, 4096, %s2589_s3, %s2609_s20, %s2991_s15, %s2991_s15, %s2990_s23  }
  0x6d   : > { %s221_s26 = scalar_lea.vmem [#allocation8], %s2601_s5  ;;  %s2160_s10 = scalar_lea.hbm %s2607_s18, 32 }
  0x6e   : > { %s229_s9 = sshll.u32 %s221_s26, 4  ;;  %p2161_p4 = scmp.ne.s32.totalorder %s2607_s18, %s2160_s10  ;;  %s230_s9 = int_to_ptr.vmem [resolvable:$true] %s229_s9 }
  0x6f   : > { %p2992_p1 = pneg %p2470_p6  ;;  %s2165_s1 = scalar_lea.hbm %s2941_s2, 96 }
  0x70   : > { %p2166_p13 = scmp.lt.u32.totalorder %s2607_s18, %s2941_s2  ;;  %p2167_p12 = scmp.lt.u32.totalorder %s2165_s1, %s2160_s10 }
  0x71   : > { %p2163_p0 = pnand %p2161_p4, %p2992_p1  ;;  %p2169_p7 = scmp.lt.u32.totalorder %s2160_s10, %s2607_s18 }
  0x72   : > { %p2168_p10 = por %p2167_p12, %p2166_p13 }
  0x73   : > { %p2164_p8 = pneg %p2163_p0 }
  0x74   : > { %p2170_p11 = por %p2169_p7, %p2168_p10 }
  0x76   : > { %p2171_p5 = pnand %p2170_p11, %p2164_p8 }
  0x78   : > { %2174 = shalt.err (!%p2171_p5)
}
  0x79   : > { %s2175_s3 = scalar_lea.vmem %s230_s9, 32  ;;  %p2993_p3 = pmov %p2992_p1 }
  0x7a   : > { %p2176_p2 = scmp.ne.s32.totalorder %s230_s9, %s2175_s3  ;;  %s2347_s20 = smov [#allocation8]  }
  0x7b   : > { %s2180_s21 = sshll.u32 %s2347_s20, 4  ;;  %s2181_s21 = int_to_ptr.vmem [resolvable:$false] %s2180_s21 }
  0x7c   : > { %p2178_p9 = pnand %p2176_p2, %p2993_p3  ;;  %s2182_s5 = scalar_lea.vmem %s2181_s21, 64 }
  0x7d   : > { %p2183_p1 = scmp.lt.s32.totalorder %s230_s9, %s2181_s21  ;;  %p2184_p0 = scmp.lt.s32.totalorder %s2182_s5, %s2175_s3 }
  0x7e   : > { %p2179_p4 = pneg %p2178_p9 }
  0x7f   : > { %p2185_p12 = por %p2184_p0, %p2183_p1 }
  0x81   : > { %p2186_p13 = pnand %p2185_p12, %p2179_p4 }
  0x83   : > { %2189 = shalt.err (!%p2186_p13)
}
  0x84   : > { %1879 = dma.hbm_to_vmem [thread:$0]  (!%p2470_p6), %s2607_s18, 32, %s230_s9, %s2477_s30  }
  0x85   : > { %p2994_p8 = scmp.ne.s32.totalorder %s2973_s29, 0 }
  0x86   : > { %s240_s14 = sand.u32 (!%p2994_p8), 1, %s2316_s19   ;;  %p2995_p10 = scmp.ne.s32.totalorder (!%p2994_p8), %s2978_s27, 0 }
  0x87   : > { %238 = sbr.rel (%p2994_p8) target bundleno = 504 (0x1f8), region = 32  ;;  %s1686_s23 = sshll.u32 (!%p2994_p8), %s240_s14, 8 }
  0x88   : > { %s241_s15 = scalar_lea.sflag (!%p2994_p8), [#allocation4], %s240_s14  ;;  %s2664_s26 = scalar_lea.vmem (!%p2994_p8), [#allocation3], %s1686_s23 }
  0x8e   : > { %2275 = dma.done.wait (%p2995_p10), %s241_s15, 4096  }
  0x8f   : > { %2277 = vsyncadd (%p2995_p10), %s241_s15, 4294963200  ;;  %s249_s30 = sand.u32 1, %s2515_s4   ;;  %s251_s11 = sand.u32 1, %s2304_s16  }
  0x90   : > { %s1687_s29 = sshll.u32 %s251_s11, 8  ;;  %s250_s18 = scalar_lea.sflag [#allocation7], %s249_s30 }
  0x91   : > { %s2674_s9 = scalar_lea.vmem [#allocation6], %s1687_s29  ;;  %p2996_p6 = scmp.ne.s32.totalorder %s2980_s7, 0 }
  0x93   : > { %2279 = dma.done.wait (%p2996_p6), %s250_s18, 4128  }
  0x94   : > { %2281 = vsyncadd (%p2996_p6), %s250_s18, 4294963168  ;;  %v2004_v0 = vld [vmem:[%s2674_s9 + $0x4] ss:$8 sps:$4 sm:$0xff]   ;;  %v2006_v1 = vld [vmem:[%s2674_s9] ss:$8 sps:$4 sm:$0xff]   ;;  %s1688_s7 = sshll.u32 %s251_s11, 1 }
  0x95   : > { %818 = vmatprep.subr.bf16.mxu0 %v2004_v0  ;;  %1829 = vmatprep.subr.bf16.mxu1 %v2004_v0  ;;  %v2007_v2 = vld [vmem:[%s2674_s9 + $0x14] ss:$8 sps:$4 sm:$0xff]   ;;  %v2009_v3 = vld [vmem:[%s2674_s9 + $0x10] ss:$8 sps:$4 sm:$0xff]   ;;  %v2010_v4 = vld [vmem:[%s2674_s9 + $0x24] ss:$8 sps:$4 sm:$0xff]   ;;  %v1209_v0 = vlaneseq }
  0x96   : > { %819 = vmatpush1.bf16.msra.mxu0 %v2006_v1  ;;  %1845 = vmatpush1.bf16.msra.mxu1 %v2006_v1  ;;  %v2012_v5 = vld [vmem:[%s2674_s9 + $0x20] ss:$8 sps:$4 sm:$0xff]   ;;  %v2013_v6 = vld [vmem:[%s2674_s9 + $0x34] ss:$8 sps:$4 sm:$0xff]   ;;  %v2015_v7 = vld [vmem:[%s2674_s9 + $0x30] ss:$8 sps:$4 sm:$0xff]  }
  0x97   : > { %820 = vmatprep.subr.bf16.mxu0 %v2007_v2  ;;  %1830 = vmatprep.subr.bf16.mxu1 %v2007_v2  ;;  %v2016_v8 = vld [vmem:[%s2674_s9 + $0x44] ss:$8 sps:$4 sm:$0xff]   ;;  %v2018_v9 = vld [vmem:[%s2674_s9 + $0x40] ss:$8 sps:$4 sm:$0xff]   ;;  %v2019_v10 = vld [vmem:[%s2674_s9 + $0x54] ss:$8 sps:$4 sm:$0xff]  }
  0x98   : > { %v2021_v11 = vld [vmem:[%s2674_s9 + $0x50] ss:$8 sps:$4 sm:$0xff]   ;;  %v2022_v12 = vld [vmem:[%s2674_s9 + $0x64] ss:$8 sps:$4 sm:$0xff]   ;;  %v2024_v14 = vld [vmem:[%s2674_s9 + $0x60] ss:$8 sps:$4 sm:$0xff]  }
  0x99   : > { %v2054_v13 = vld [vmem:[%s2664_s26 + $0x4] ss:$8 sps:$4 sm:$0xff]   ;;  %v2025_v16 = vld [vmem:[%s2674_s9 + $0x74] ss:$8 sps:$4 sm:$0xff]   ;;  %v2027_v17 = vld [vmem:[%s2674_s9 + $0x70] ss:$8 sps:$4 sm:$0xff]  }
  0x9a   : > { %821 = vmatpush1.bf16.msra.mxu0 %v2009_v3  ;;  %1846 = vmatpush1.bf16.msra.mxu1 %v2009_v3  ;;  %v2057_v15 = vld [vmem:[%s2664_s26 + $0x84] ss:$8 sps:$4 sm:$0xff]   ;;  %v2030_v19 = vld [vmem:[%s2674_s9 + $0x80] ss:$8 sps:$4 sm:$0xff]   ;;  %v2031_v20 = vld [vmem:[%s2674_s9 + $0x94] ss:$8 sps:$4 sm:$0xff]  }
  0x9b   : > { %822 = vmatprep.subr.bf16.mxu0 %v2010_v4  ;;  %1831 = vmatprep.subr.bf16.mxu1 %v2010_v4  ;;  %v2028_v18 = vld [vmem:[%s2674_s9 + $0x84] ss:$8 sps:$4 sm:$0xff]   ;;  %v2033_v21 = vld [vmem:[%s2674_s9 + $0x90] ss:$8 sps:$4 sm:$0xff]   ;;  %v2036_v23 = vld [vmem:[%s2674_s9 + $0xa0] ss:$8 sps:$4 sm:$0xff]  }
  0x9c   : > { %850 = vmatprep.mubr.bf16.mxu0 %v2054_v13  ;;  %930 = vmatprep.mubr.bf16.mxu1 %v2057_v15  ;;  %v2034_v22 = vld [vmem:[%s2674_s9 + $0xa4] ss:$8 sps:$4 sm:$0xff]   ;;  %v2037_v24 = vld [vmem:[%s2674_s9 + $0xb4] ss:$8 sps:$4 sm:$0xff]   ;;  %v2039_v25 = vld [vmem:[%s2674_s9 + $0xb0] ss:$8 sps:$4 sm:$0xff]  }
  0x9d   : > { %v2040_v26 = vld [vmem:[%s2674_s9 + $0xc4] ss:$8 sps:$4 sm:$0xff]   ;;  %v2042_v27 = vld [vmem:[%s2674_s9 + $0xc0] ss:$8 sps:$4 sm:$0xff]   ;;  %v2043_v28 = vld [vmem:[%s2674_s9 + $0xd4] ss:$8 sps:$4 sm:$0xff]  }
  0x9e   : > { %823 = vmatpush1.bf16.msra.mxu0 %v2012_v5  ;;  %1847 = vmatpush1.bf16.msra.mxu1 %v2012_v5  ;;  %v2045_v29 = vld [vmem:[%s2674_s9 + $0xd0] ss:$8 sps:$4 sm:$0xff]   ;;  %v2046_v30 = vld [vmem:[%s2674_s9 + $0xe4] ss:$8 sps:$4 sm:$0xff]   ;;  %v2048_v31 = vld [vmem:[%s2674_s9 + $0xe0] ss:$8 sps:$4 sm:$0xff]  }
  0x9f   : > { %824 = vmatprep.subr.bf16.mxu0 %v2013_v6  ;;  %1832 = vmatprep.subr.bf16.mxu1 %v2013_v6  ;;  %v2049_v32 = vld [vmem:[%s2674_s9 + $0xf4] ss:$8 sps:$4 sm:$0xff]   ;;  %v2051_v33 = vld [vmem:[%s2674_s9 + $0xf0] ss:$8 sps:$4 sm:$0xff]   ;;  %v2052_v34 = vld [vmem:[%s2664_s26] ss:$8 sps:$4 sm:$0xff]  }
  0xa0   : > { %v2055_v35 = vld [vmem:[%s2664_s26 + $0x80] ss:$8 sps:$4 sm:$0xff]   ;;  %v2058_v36 = vld [vmem:[%s2664_s26 + $0x14] ss:$8 sps:$4 sm:$0xff]   ;;  %v2062_v38 = vld [vmem:[%s2664_s26 + $0x10] ss:$8 sps:$4 sm:$0xff]  }
  0xa1   : > { %v2060_v37 = vld [vmem:[%s2664_s26 + $0x94] ss:$8 sps:$4 sm:$0xff]   ;;  %v2063_v39 = vld [vmem:[%s2664_s26 + $0x90] ss:$8 sps:$4 sm:$0xff]   ;;  %v2064_v40 = vld [vmem:[%s2664_s26 + $0x24] ss:$8 sps:$4 sm:$0xff]  }
  0xa2   : > { %825 = vmatpush1.bf16.msra.mxu0 %v2015_v7  ;;  %1848 = vmatpush1.bf16.msra.mxu1 %v2015_v7  ;;  %v2066_v41 = vld [vmem:[%s2664_s26 + $0xa4] ss:$8 sps:$4 sm:$0xff]   ;;  %v2068_v42 = vld [vmem:[%s2664_s26 + $0x20] ss:$8 sps:$4 sm:$0xff]   ;;  %v2070_v44 = vld [vmem:[%s2664_s26 + $0x34] ss:$8 sps:$4 sm:$0xff]  }
  0xa3   : > { %826 = vmatprep.subr.bf16.mxu0 %v2016_v8  ;;  %1833 = vmatprep.subr.bf16.mxu1 %v2016_v8  ;;  %v2069_v43 = vld [vmem:[%s2664_s26 + $0xa0] ss:$8 sps:$4 sm:$0xff]   ;;  %v2072_v45 = vld [vmem:[%s2664_s26 + $0xb4] ss:$8 sps:$4 sm:$0xff]   ;;  %v2074_v46 = vld [vmem:[%s2664_s26 + $0x30] ss:$8 sps:$4 sm:$0xff]  }
  0xa4   : > { %v2075_v47 = vld [vmem:[%s2664_s26 + $0xb0] ss:$8 sps:$4 sm:$0xff]   ;;  %v2076_v48 = vld [vmem:[%s2664_s26 + $0x44] ss:$8 sps:$4 sm:$0xff]   ;;  %v2080_v50 = vld [vmem:[%s2664_s26 + $0x40] ss:$8 sps:$4 sm:$0xff]  }
  0xa5   : > { %v2078_v49 = vld [vmem:[%s2664_s26 + $0xc4] ss:$8 sps:$4 sm:$0xff]   ;;  %v2081_v51 = vld [vmem:[%s2664_s26 + $0xc0] ss:$8 sps:$4 sm:$0xff]   ;;  %v2082_v52 = vld [vmem:[%s2664_s26 + $0x54] ss:$8 sps:$4 sm:$0xff]  }
  0xa6   : > { %827 = vmatpush1.bf16.msra.mxu0 %v2018_v9  ;;  %1849 = vmatpush1.bf16.msra.mxu1 %v2018_v9  ;;  %v2084_v53 = vld [vmem:[%s2664_s26 + $0xd4] ss:$8 sps:$4 sm:$0xff]   ;;  %v2086_v54 = vld [vmem:[%s2664_s26 + $0x50] ss:$8 sps:$4 sm:$0xff]   ;;  %v2088_v56 = vld [vmem:[%s2664_s26 + $0x64] ss:$8 sps:$4 sm:$0xff]  }
  0xa7   : > { %828 = vmatprep.subr.bf16.mxu0 %v2019_v10  ;;  %1834 = vmatprep.subr.bf16.mxu1 %v2019_v10  ;;  %v2087_v55 = vld [vmem:[%s2664_s26 + $0xd0] ss:$8 sps:$4 sm:$0xff]   ;;  %v2090_v57 = vld [vmem:[%s2664_s26 + $0xe4] ss:$8 sps:$4 sm:$0xff]   ;;  %v2092_v58 = vld [vmem:[%s2664_s26 + $0x60] ss:$8 sps:$4 sm:$0xff]  }
  0xa8   : > { %v2093_v59 = vld [vmem:[%s2664_s26 + $0xe0] ss:$8 sps:$4 sm:$0xff]   ;;  %v2094_v60 = vld [vmem:[%s2664_s26 + $0x74] ss:$8 sps:$4 sm:$0xff]   ;;  %v2098_v62 = vld [vmem:[%s2664_s26 + $0x70] ss:$8 sps:$4 sm:$0xff]  }
  0xa9   : > { %v2096_v61 = vld [vmem:[%s2664_s26 + $0xf4] ss:$8 sps:$4 sm:$0xff]   ;;  %v2099_v63 = vld [vmem:[%s2664_s26 + $0xf0] ss:$8 sps:$4 sm:$0xff]   ;;  %v1210_v1 = vshrl.u32 %v1209_v0, 7  ;;  %s262_s4 = scalar_lea.vmem [#allocation8], %s1688_s7 }
  0xaa   : > { %829 = vmatpush1.bf16.msra.mxu0 %v2021_v11  ;;  %1850 = vmatpush1.bf16.msra.mxu1 %v2021_v11  ;;  %v1206_v2 = vld [vmem:[%s262_s4] sm:$0x3]  ;;  %s292_s27 = sand.u32 1, %s2292_s13   ;;  %s2997_s24 = sld [smem:[#allocation17_spill]] }
  0xab   : > { %830 = vmatprep.subr.bf16.mxu0 %v2022_v12  ;;  %1835 = vmatprep.subr.bf16.mxu1 %v2022_v12  ;;  %v1207_v3 = vunpack.c.l.bf16 %v1206_v2  ;;  %v1211_v4 = vsub.s32 0, %v1210_v1  ;;  %v1215_v5 = vsub.s32 2, %v1210_v1  ;;  %s1689_s10 = sshll.u32 %s292_s27, 8  ;;  %s2998_s1 = sld [smem:[#allocation16_spill]] }
  0xac   : > { %s2761_s6 = scalar_lea.vmem [#allocation9], %s1689_s10  ;;  %s2999_s23 = sld [smem:[#allocation26_spill]] }
  0xad   : > { %v1212_v6 = vrot.slane %v1207_v3, %v1211_v4  ;;  %v1216_v7 = vrot.slane %v1207_v3, %v1215_v5  ;;  %s1532_s21 = sshll.u32 %s2761_s6, 4  ;;  %s2863_s30 = scalar_lea.sflag [#allocation5], %s292_s27  ;;  %s2855_s21 = int_to_ptr.vmem [resolvable:$true] %s1532_s21 }
  0xae   : > { %831 = vmatpush1.bf16.msra.mxu0 %v2024_v14  ;;  %1851 = vmatpush1.bf16.msra.mxu1 %v2024_v14  ;;  %s2190_s11 = scalar_lea.vmem %s2855_s21, 4096  ;;  %p3001_p11 = scmp.ne.s32.totalorder %s2985_s28, 0 }
  0xaf   : > { %832 = vmatprep.subr.bf16.mxu0 %v2025_v16  ;;  %1836 = vmatprep.subr.bf16.mxu1 %v2025_v16  ;;  %v2746_v8 = vrot.slane %v1212_v6, %v1211_v4  ;;  %v2749_v9 = vrot.slane %v1216_v7, %v1211_v4  ;;  %p2191_p7 = scmp.ne.s32.totalorder %s2855_s21, %s2190_s11  ;;  %s2348_s29 = smov [#allocation9]  }
  0xb0   : > { %s1861_s17 = smul.u32 192, %s2997_s24  ;;  %s2194_s18 = sshll.u32 %s2348_s29, 4  ;;  %s2195_s18 = int_to_ptr.vmem [resolvable:$false] %s2194_s18 }
  0xb1   : > { %s1788_s22 = sshll.u32 %s2998_s1, 1  ;;  %p2192_p5 = pnand %p2191_p7, %p3001_p11 }
  0xb2   : > { %833 = vmatpush1.bf16.msra.mxu0 %v2027_v17  ;;  %1852 = vmatpush1.bf16.msra.mxu1 %v2027_v17  ;;  %s1529_s3 = sadd.s32 %s1861_s17, %s1788_s22  ;;  %s3000_s26 = smov %s2999_s23 }
  0xb3   : > { %834 = vmatprep.subr.bf16.mxu0 %v2028_v18  ;;  %1837 = vmatprep.subr.bf16.mxu1 %v2028_v18  ;;  %s1790_s20 = sshll.u32 %s1529_s3, 6  ;;  %p2193_p2 = pneg %p2192_p5 }
  0xb4   : > { %s2853_s15 = scalar_lea.hbm %s2999_s23, %s1790_s20  ;;  %s2196_s9 = scalar_lea.vmem %s2195_s18, 8192 }
  0xb5   : > { %p2197_p3 = scmp.lt.s32.totalorder %s2855_s21, %s2195_s18  ;;  %p2198_p9 = scmp.lt.s32.totalorder %s2196_s9, %s2190_s11 }
  0xb6   : > { %835 = vmatpush1.bf16.msra.mxu0 %v2030_v19  ;;  %1853 = vmatpush1.bf16.msra.mxu1 %v2030_v19 }
  0xb7   : > { %836 = vmatprep.subr.bf16.mxu0 %v2031_v20  ;;  %1838 = vmatprep.subr.bf16.mxu1 %v2031_v20  ;;  %p2199_p4 = por %p2198_p9, %p2197_p3 }
  0xb9   : > { %p2200_p1 = pnand %p2199_p4, %p2193_p2 }
  0xba   : > { %837 = vmatpush1.bf16.msra.mxu0 %v2033_v21  ;;  %1854 = vmatpush1.bf16.msra.mxu1 %v2033_v21 }
  0xbb   : > { %838 = vmatprep.subr.bf16.mxu0 %v2034_v22  ;;  %1839 = vmatprep.subr.bf16.mxu1 %v2034_v22 }
  0xbe   : > { %839 = vmatpush1.bf16.msra.mxu0 %v2036_v23  ;;  %1855 = vmatpush1.bf16.msra.mxu1 %v2036_v23 }
  0xbf   : > { %840 = vmatprep.subr.bf16.mxu0 %v2037_v24  ;;  %1840 = vmatprep.subr.bf16.mxu1 %v2037_v24 }
  0xc2   : > { %841 = vmatpush1.bf16.msra.mxu0 %v2039_v25  ;;  %1856 = vmatpush1.bf16.msra.mxu1 %v2039_v25 }
  0xc3   : > { %842 = vmatprep.subr.bf16.mxu0 %v2040_v26  ;;  %1841 = vmatprep.subr.bf16.mxu1 %v2040_v26 }
  0xc6   : > { %843 = vmatpush1.bf16.msra.mxu0 %v2042_v27  ;;  %1857 = vmatpush1.bf16.msra.mxu1 %v2042_v27 }
  0xc7   : > { %844 = vmatprep.subr.bf16.mxu0 %v2043_v28  ;;  %1842 = vmatprep.subr.bf16.mxu1 %v2043_v28 }
  0xca   : > { %845 = vmatpush1.bf16.msra.mxu0 %v2045_v29  ;;  %1858 = vmatpush1.bf16.msra.mxu1 %v2045_v29 }
  0xcb   : > { %846 = vmatprep.subr.bf16.mxu0 %v2046_v30  ;;  %1843 = vmatprep.subr.bf16.mxu1 %v2046_v30 }
  0xce   : > { %847 = vmatpush1.bf16.msra.mxu0 %v2048_v31  ;;  %1859 = vmatpush1.bf16.msra.mxu1 %v2048_v31 }
  0xcf   : > { %848 = vmatprep.subr.bf16.mxu0 %v2049_v32  ;;  %1844 = vmatprep.subr.bf16.mxu1 %v2049_v32 }
  0xd2   : > { %849 = vmatpush1.bf16.msra.mxu0 %v2051_v33  ;;  %1860 = vmatpush1.bf16.msra.mxu1 %v2051_v33 }
  0xd5   : > { %851 = vmatmul.mubr.bf16.vlgmr.msra.gmra.mrb[0].mxu0 %v2052_v34  ;;  %931 = vmatmul.mubr.bf16.vlgmr.msra.gmra.mrb[0].mxu1 %v2055_v35 }
  0xd6   : > { %860 = vmatprep.mubr.bf16.mxu0 %v2058_v36  ;;  %940 = vmatprep.mubr.bf16.mxu1 %v2060_v37 }
  0xdd   : > { %861 = vmatmul.mubr.bf16.gmra.mrb[4].mxu0 %v2062_v38  ;;  %941 = vmatmul.mubr.bf16.gmra.mrb[4].mxu1 %v2063_v39 }
  0xde   : > { %870 = vmatprep.mubr.bf16.mxu0 %v2064_v40  ;;  %950 = vmatprep.mubr.bf16.mxu1 %v2066_v41 }
  0xe5   : > { %871 = vmatmul.mubr.bf16.gmra.mrb[8].mxu0 %v2068_v42  ;;  %951 = vmatmul.mubr.bf16.gmra.mrb[8].mxu1 %v2069_v43 }
  0xe6   : > { %880 = vmatprep.mubr.bf16.mxu0 %v2070_v44  ;;  %960 = vmatprep.mubr.bf16.mxu1 %v2072_v45 }
  0xed   : > { %881 = vmatmul.mubr.bf16.gmra.mrb[12].mxu0 %v2074_v46  ;;  %961 = vmatmul.mubr.bf16.gmra.mrb[12].mxu1 %v2075_v47 }
  0xee   : > { %890 = vmatprep.mubr.bf16.mxu0 %v2076_v48  ;;  %970 = vmatprep.mubr.bf16.mxu1 %v2078_v49 }
  0xf5   : > { %891 = vmatmul.mubr.bf16.gmra.mrb[16].mxu0 %v2080_v50  ;;  %971 = vmatmul.mubr.bf16.gmra.mrb[16].mxu1 %v2081_v51 }
  0xf6   : > { %900 = vmatprep.mubr.bf16.mxu0 %v2082_v52  ;;  %980 = vmatprep.mubr.bf16.mxu1 %v2084_v53 }
  0xfd   : > { %901 = vmatmul.mubr.bf16.gmra.mrb[20].mxu0 %v2086_v54  ;;  %981 = vmatmul.mubr.bf16.gmra.mrb[20].mxu1 %v2087_v55 }
  0xfe   : > { %910 = vmatprep.mubr.bf16.mxu0 %v2088_v56  ;;  %990 = vmatprep.mubr.bf16.mxu1 %v2090_v57 }
 0x105   : > { %911 = vmatmul.mubr.bf16.gmra.mrb[24].mxu0 %v2092_v58  ;;  %991 = vmatmul.mubr.bf16.gmra.mrb[24].mxu1 %v2093_v59 }
 0x106   : > { %920 = vmatprep.mubr.bf16.mxu0 %v2094_v60  ;;  %1000 = vmatprep.mubr.bf16.mxu1 %v2096_v61 }
 0x10d   : > { %921 = vmatmul.mubr.bf16.gmra.mrb[28].mxu0 %v2098_v62  ;;  %1001 = vmatmul.mubr.bf16.gmra.mrb[28].mxu1 %v2099_v63 }
 0x1a8   : > { %v852_v10 = vpop.f32.mrb[0].mxu0  ;;  %v932_v11 = vpop.f32.mrb[0].mxu1 }
 0x1a9   : > { %v1227_v12 = vadd.f32 %v2746_v8, %v852_v10  ;;  %v1259_v13 = vadd.f32 %v2746_v8, %v932_v11  ;;  %v854_v14 = vpop.f32.mrb[1].mxu0  ;;  %v934_v15 = vpop.f32.mrb[1].mxu1 }
 0x1aa   : > { %v1228_v16 = vadd.f32 %v2749_v9, %v854_v14  ;;  %v1260_v17 = vadd.f32 %v2749_v9, %v934_v15  ;;  %v856_v18 = vpop.f32.mrb[2].mxu0  ;;  %v936_v19 = vpop.f32.mrb[2].mxu1 }
 0x1ab   : > { %v1229_v20 = vadd.f32 %v2746_v8, %v856_v18  ;;  %v1261_v21 = vadd.f32 %v2746_v8, %v936_v19  ;;  %v858_v22 = vpop.f32.mrb[3].mxu0  ;;  %v938_v23 = vpop.f32.mrb[3].mxu1 }
 0x1ac   : > { %v1797_v24 = vpack.c.bf16 %v1228_v16, %v1227_v12  ;;  %v1813_v25 = vpack.c.bf16 %v1260_v17, %v1259_v13  ;;  %v1230_v26 = vadd.f32 %v2749_v9, %v858_v22  ;;  %v1262_v27 = vadd.f32 %v2749_v9, %v938_v23 }
 0x1ae   : > { %1483 = vst [vmem:[%s2761_s6] sm:$0xff] %v1797_v24  ;;  %1499 = vst [vmem:[%s2761_s6 + $0x80] sm:$0xff] %v1813_v25  ;;  %v1798_v28 = vpack.c.bf16 %v1230_v26, %v1229_v20  ;;  %v1814_v29 = vpack.c.bf16 %v1262_v27, %v1261_v21 }
 0x1b0   : > { %1484 = vst [vmem:[%s2761_s6 + $0x8] sm:$0xff] %v1798_v28  ;;  %1500 = vst [vmem:[%s2761_s6 + $0x88] sm:$0xff] %v1814_v29  ;;  %v862_v30 = vpop.f32.mrb[4].mxu0  ;;  %v942_v31 = vpop.f32.mrb[4].mxu1 }
 0x1b1   : > { %v1231_v32 = vadd.f32 %v2746_v8, %v862_v30  ;;  %v1263_v33 = vadd.f32 %v2746_v8, %v942_v31  ;;  %v864_v34 = vpop.f32.mrb[5].mxu0  ;;  %v944_v35 = vpop.f32.mrb[5].mxu1 }
 0x1b2   : > { %v1232_v36 = vadd.f32 %v2749_v9, %v864_v34  ;;  %v1264_v37 = vadd.f32 %v2749_v9, %v944_v35  ;;  %v866_v38 = vpop.f32.mrb[6].mxu0  ;;  %v946_v39 = vpop.f32.mrb[6].mxu1 }
 0x1b3   : > { %v1233_v40 = vadd.f32 %v2746_v8, %v866_v38  ;;  %v1265_v41 = vadd.f32 %v2746_v8, %v946_v39  ;;  %v868_v42 = vpop.f32.mrb[7].mxu0  ;;  %v948_v43 = vpop.f32.mrb[7].mxu1 }
 0x1b4   : > { %v1799_v44 = vpack.c.bf16 %v1232_v36, %v1231_v32  ;;  %v1815_v45 = vpack.c.bf16 %v1264_v37, %v1263_v33  ;;  %v1234_v46 = vadd.f32 %v2749_v9, %v868_v42  ;;  %v1266_v47 = vadd.f32 %v2749_v9, %v948_v43 }
 0x1b6   : > { %1485 = vst [vmem:[%s2761_s6 + $0x10] sm:$0xff] %v1799_v44  ;;  %1501 = vst [vmem:[%s2761_s6 + $0x90] sm:$0xff] %v1815_v45  ;;  %v1800_v48 = vpack.c.bf16 %v1234_v46, %v1233_v40  ;;  %v1816_v49 = vpack.c.bf16 %v1266_v47, %v1265_v41 }
 0x1b8   : > { %1486 = vst [vmem:[%s2761_s6 + $0x18] sm:$0xff] %v1800_v48  ;;  %1502 = vst [vmem:[%s2761_s6 + $0x98] sm:$0xff] %v1816_v49  ;;  %v872_v50 = vpop.f32.mrb[8].mxu0  ;;  %v952_v51 = vpop.f32.mrb[8].mxu1 }
 0x1b9   : > { %v1235_v52 = vadd.f32 %v2746_v8, %v872_v50  ;;  %v1267_v53 = vadd.f32 %v2746_v8, %v952_v51  ;;  %v874_v54 = vpop.f32.mrb[9].mxu0  ;;  %v954_v55 = vpop.f32.mrb[9].mxu1 }
 0x1ba   : > { %v1236_v56 = vadd.f32 %v2749_v9, %v874_v54  ;;  %v1268_v57 = vadd.f32 %v2749_v9, %v954_v55  ;;  %v876_v58 = vpop.f32.mrb[10].mxu0  ;;  %v956_v59 = vpop.f32.mrb[10].mxu1 }
 0x1bb   : > { %v1237_v60 = vadd.f32 %v2746_v8, %v876_v58  ;;  %v1269_v61 = vadd.f32 %v2746_v8, %v956_v59  ;;  %v878_v62 = vpop.f32.mrb[11].mxu0  ;;  %v958_v63 = vpop.f32.mrb[11].mxu1 }
 0x1bc   : > { %v1801_v0 = vpack.c.bf16 %v1236_v56, %v1235_v52  ;;  %v1817_v1 = vpack.c.bf16 %v1268_v57, %v1267_v53  ;;  %v1238_v2 = vadd.f32 %v2749_v9, %v878_v62  ;;  %v1270_v3 = vadd.f32 %v2749_v9, %v958_v63 }
 0x1be   : > { %1487 = vst [vmem:[%s2761_s6 + $0x20] sm:$0xff] %v1801_v0  ;;  %1503 = vst [vmem:[%s2761_s6 + $0xa0] sm:$0xff] %v1817_v1  ;;  %v1802_v4 = vpack.c.bf16 %v1238_v2, %v1237_v60  ;;  %v1818_v5 = vpack.c.bf16 %v1270_v3, %v1269_v61 }
 0x1c0   : > { %1488 = vst [vmem:[%s2761_s6 + $0x28] sm:$0xff] %v1802_v4  ;;  %1504 = vst [vmem:[%s2761_s6 + $0xa8] sm:$0xff] %v1818_v5  ;;  %v882_v6 = vpop.f32.mrb[12].mxu0  ;;  %v962_v7 = vpop.f32.mrb[12].mxu1 }
 0x1c1   : > { %v1239_v10 = vadd.f32 %v2746_v8, %v882_v6  ;;  %v1271_v11 = vadd.f32 %v2746_v8, %v962_v7  ;;  %v884_v12 = vpop.f32.mrb[13].mxu0  ;;  %v964_v13 = vpop.f32.mrb[13].mxu1 }
 0x1c2   : > { %v1240_v14 = vadd.f32 %v2749_v9, %v884_v12  ;;  %v1272_v15 = vadd.f32 %v2749_v9, %v964_v13  ;;  %v886_v16 = vpop.f32.mrb[14].mxu0  ;;  %v966_v17 = vpop.f32.mrb[14].mxu1 }
 0x1c3   : > { %v1241_v18 = vadd.f32 %v2746_v8, %v886_v16  ;;  %v1273_v19 = vadd.f32 %v2746_v8, %v966_v17  ;;  %v888_v20 = vpop.f32.mrb[15].mxu0  ;;  %v968_v21 = vpop.f32.mrb[15].mxu1 }
 0x1c4   : > { %v1803_v22 = vpack.c.bf16 %v1240_v14, %v1239_v10  ;;  %v1819_v23 = vpack.c.bf16 %v1272_v15, %v1271_v11  ;;  %v1242_v24 = vadd.f32 %v2749_v9, %v888_v20  ;;  %v1274_v25 = vadd.f32 %v2749_v9, %v968_v21 }
 0x1c6   : > { %1489 = vst [vmem:[%s2761_s6 + $0x30] sm:$0xff] %v1803_v22  ;;  %1505 = vst [vmem:[%s2761_s6 + $0xb0] sm:$0xff] %v1819_v23  ;;  %v1804_v26 = vpack.c.bf16 %v1242_v24, %v1241_v18  ;;  %v1820_v27 = vpack.c.bf16 %v1274_v25, %v1273_v19 }
 0x1c8   : > { %1490 = vst [vmem:[%s2761_s6 + $0x38] sm:$0xff] %v1804_v26  ;;  %1506 = vst [vmem:[%s2761_s6 + $0xb8] sm:$0xff] %v1820_v27  ;;  %v892_v28 = vpop.f32.mrb[16].mxu0  ;;  %v972_v29 = vpop.f32.mrb[16].mxu1 }
 0x1c9   : > { %v1243_v30 = vadd.f32 %v2746_v8, %v892_v28  ;;  %v1275_v31 = vadd.f32 %v2746_v8, %v972_v29  ;;  %v894_v32 = vpop.f32.mrb[17].mxu0  ;;  %v974_v33 = vpop.f32.mrb[17].mxu1 }
 0x1ca   : > { %v1244_v34 = vadd.f32 %v2749_v9, %v894_v32  ;;  %v1276_v35 = vadd.f32 %v2749_v9, %v974_v33  ;;  %v896_v36 = vpop.f32.mrb[18].mxu0  ;;  %v976_v37 = vpop.f32.mrb[18].mxu1 }
 0x1cb   : > { %v1245_v38 = vadd.f32 %v2746_v8, %v896_v36  ;;  %v1277_v39 = vadd.f32 %v2746_v8, %v976_v37  ;;  %v898_v40 = vpop.f32.mrb[19].mxu0  ;;  %v978_v41 = vpop.f32.mrb[19].mxu1 }
 0x1cc   : > { %v1805_v42 = vpack.c.bf16 %v1244_v34, %v1243_v30  ;;  %v1821_v43 = vpack.c.bf16 %v1276_v35, %v1275_v31  ;;  %v1246_v44 = vadd.f32 %v2749_v9, %v898_v40  ;;  %v1278_v45 = vadd.f32 %v2749_v9, %v978_v41 }
 0x1ce   : > { %1491 = vst [vmem:[%s2761_s6 + $0x40] sm:$0xff] %v1805_v42  ;;  %1507 = vst [vmem:[%s2761_s6 + $0xc0] sm:$0xff] %v1821_v43  ;;  %v1806_v46 = vpack.c.bf16 %v1246_v44, %v1245_v38  ;;  %v1822_v47 = vpack.c.bf16 %v1278_v45, %v1277_v39 }
 0x1d0   : > { %1492 = vst [vmem:[%s2761_s6 + $0x48] sm:$0xff] %v1806_v46  ;;  %1508 = vst [vmem:[%s2761_s6 + $0xc8] sm:$0xff] %v1822_v47  ;;  %v902_v48 = vpop.f32.mrb[20].mxu0  ;;  %v982_v49 = vpop.f32.mrb[20].mxu1 }
 0x1d1   : > { %v1247_v50 = vadd.f32 %v2746_v8, %v902_v48  ;;  %v1279_v51 = vadd.f32 %v2746_v8, %v982_v49  ;;  %v904_v52 = vpop.f32.mrb[21].mxu0  ;;  %v984_v53 = vpop.f32.mrb[21].mxu1 }
 0x1d2   : > { %v1248_v54 = vadd.f32 %v2749_v9, %v904_v52  ;;  %v1280_v55 = vadd.f32 %v2749_v9, %v984_v53  ;;  %v906_v56 = vpop.f32.mrb[22].mxu0  ;;  %v986_v57 = vpop.f32.mrb[22].mxu1 }
 0x1d3   : > { %v1249_v58 = vadd.f32 %v2746_v8, %v906_v56  ;;  %v1281_v59 = vadd.f32 %v2746_v8, %v986_v57  ;;  %v908_v60 = vpop.f32.mrb[23].mxu0  ;;  %v988_v61 = vpop.f32.mrb[23].mxu1 }
 0x1d4   : > { %v1807_v62 = vpack.c.bf16 %v1248_v54, %v1247_v50  ;;  %v1823_v63 = vpack.c.bf16 %v1280_v55, %v1279_v51  ;;  %v1250_v0 = vadd.f32 %v2749_v9, %v908_v60  ;;  %v1282_v1 = vadd.f32 %v2749_v9, %v988_v61 }
 0x1d6   : > { %1493 = vst [vmem:[%s2761_s6 + $0x50] sm:$0xff] %v1807_v62  ;;  %1509 = vst [vmem:[%s2761_s6 + $0xd0] sm:$0xff] %v1823_v63  ;;  %v1808_v2 = vpack.c.bf16 %v1250_v0, %v1249_v58  ;;  %v1824_v3 = vpack.c.bf16 %v1282_v1, %v1281_v59 }
 0x1d8   : > { %1494 = vst [vmem:[%s2761_s6 + $0x58] sm:$0xff] %v1808_v2  ;;  %1510 = vst [vmem:[%s2761_s6 + $0xd8] sm:$0xff] %v1824_v3  ;;  %v912_v4 = vpop.f32.mrb[24].mxu0  ;;  %v992_v5 = vpop.f32.mrb[24].mxu1 }
 0x1d9   : > { %v1251_v6 = vadd.f32 %v2746_v8, %v912_v4  ;;  %v1283_v7 = vadd.f32 %v2746_v8, %v992_v5  ;;  %v914_v10 = vpop.f32.mrb[25].mxu0  ;;  %v994_v11 = vpop.f32.mrb[25].mxu1 }
 0x1da   : > { %v1252_v12 = vadd.f32 %v2749_v9, %v914_v10  ;;  %v1284_v13 = vadd.f32 %v2749_v9, %v994_v11  ;;  %v916_v14 = vpop.f32.mrb[26].mxu0  ;;  %v996_v15 = vpop.f32.mrb[26].mxu1 }
 0x1db   : > { %v1253_v16 = vadd.f32 %v2746_v8, %v916_v14  ;;  %v1285_v17 = vadd.f32 %v2746_v8, %v996_v15  ;;  %v918_v18 = vpop.f32.mrb[27].mxu0  ;;  %v998_v19 = vpop.f32.mrb[27].mxu1 }
 0x1dc   : > { %v1809_v20 = vpack.c.bf16 %v1252_v12, %v1251_v6  ;;  %v1825_v21 = vpack.c.bf16 %v1284_v13, %v1283_v7  ;;  %v1254_v22 = vadd.f32 %v2749_v9, %v918_v18  ;;  %v1286_v23 = vadd.f32 %v2749_v9, %v998_v19 }
 0x1de   : > { %1495 = vst [vmem:[%s2761_s6 + $0x60] sm:$0xff] %v1809_v20  ;;  %1511 = vst [vmem:[%s2761_s6 + $0xe0] sm:$0xff] %v1825_v21  ;;  %v1810_v24 = vpack.c.bf16 %v1254_v22, %v1253_v16  ;;  %v1826_v25 = vpack.c.bf16 %v1286_v23, %v1285_v17 }
 0x1e0   : > { %1496 = vst [vmem:[%s2761_s6 + $0x68] sm:$0xff] %v1810_v24  ;;  %1512 = vst [vmem:[%s2761_s6 + $0xe8] sm:$0xff] %v1826_v25  ;;  %v922_v26 = vpop.f32.mrb[28].mxu0  ;;  %v1002_v27 = vpop.f32.mrb[28].mxu1 }
 0x1e1   : > { %v1255_v28 = vadd.f32 %v2746_v8, %v922_v26  ;;  %v1287_v29 = vadd.f32 %v2746_v8, %v1002_v27  ;;  %v924_v30 = vpop.f32.mrb[29].mxu0  ;;  %v1004_v31 = vpop.f32.mrb[29].mxu1 }
 0x1e2   : > { %v1256_v32 = vadd.f32 %v2749_v9, %v924_v30  ;;  %v1288_v33 = vadd.f32 %v2749_v9, %v1004_v31  ;;  %v926_v34 = vpop.f32.mrb[30].mxu0  ;;  %v1006_v35 = vpop.f32.mrb[30].mxu1 }
 0x1e3   : > { %v1257_v36 = vadd.f32 %v2746_v8, %v926_v34  ;;  %v1289_v37 = vadd.f32 %v2746_v8, %v1006_v35  ;;  %v928_v38 = vpop.f32.mrb[31].mxu0  ;;  %v1008_v39 = vpop.f32.mrb[31].mxu1 }
 0x1e4   : > { %v1811_v40 = vpack.c.bf16 %v1256_v32, %v1255_v28  ;;  %v1827_v41 = vpack.c.bf16 %v1288_v33, %v1287_v29  ;;  %v1258_v42 = vadd.f32 %v2749_v9, %v928_v38  ;;  %v1290_v43 = vadd.f32 %v2749_v9, %v1008_v39 }
 0x1e6   : > { %1497 = vst [vmem:[%s2761_s6 + $0x70] sm:$0xff] %v1811_v40  ;;  %1513 = vst [vmem:[%s2761_s6 + $0xf0] sm:$0xff] %v1827_v41  ;;  %v1812_v8 = vpack.c.bf16 %v1258_v42, %v1257_v36  ;;  %v1828_v44 = vpack.c.bf16 %v1290_v43, %v1289_v37 }
 0x1e8   : > { %1498 = vst [vmem:[%s2761_s6 + $0x78] sm:$0xff] %v1812_v8  ;;  %1514 = vst [vmem:[%s2761_s6 + $0xf8] sm:$0xff] %v1828_v44 }
 0x1e9   : > { %2203 = shalt.err (!%p2200_p1)
}
 0x1ea   : > { %s2204_s7 = scalar_lea.hbm %s2853_s15, 4096  ;;  %s2208_s10 = scalar_lea.hbm %s3000_s26, 49152 }
 0x1eb   : > { %p2205_p0 = scmp.ne.s32.totalorder %s2853_s15, %s2204_s7  ;;  %p2209_p8 = scmp.lt.u32.totalorder %s2853_s15, %s3000_s26 }
 0x1ec   : > { %p2210_p10 = scmp.lt.u32.totalorder %s2208_s10, %s2204_s7  ;;  %p2212_p7 = scmp.lt.u32.totalorder %s2204_s7, %s2853_s15 }
 0x1ed   : > { %p2206_p12 = pnand %p2205_p0, %p3001_p11 }
 0x1ee   : > { %p2211_p6 = por %p2210_p10, %p2209_p8 }
 0x1ef   : > { %p2207_p13 = pneg %p2206_p12 }
 0x1f0   : > { %p2213_p5 = por %p2212_p7, %p2211_p6 }
 0x1f2   : > { %p2214_p2 = pnand %p2213_p5, %p2207_p13 }
 0x1f4   : > { %2217 = shalt.err (!%p2214_p2)
}
 0x1f5   : > { %s2349_s1 = smov 128   ;;  %s2350_s17 = smov 384  }
 0x1f6   : > { %s2351_s22 = smov 8  }
 0x1f7   : > { %1868 = dma.vmem_to_hbm [thread:$0]  (%p3001_p11), %s2855_s21, 4096, %s2853_s15, %s2863_s30, %s2349_s1, %s2350_s17, %s2351_s22  }
 0x1f8 PF: > { %p1885_p3 = scmp.ge.s32.totalorder %s2340_s25, 2  ;;  %s1547_s3 = sand.u32 1, %s2288_s12  }
 0x1f9   : > { %p3002_p9 = scmp.ne.s32.totalorder %s2986_s8, 0  ;;  %s1548_s20 = scalar_lea.sflag [#allocation5], %s1547_s3 }
 0x1fb   : > { %p1881_p4 = pnand %p1885_p3, %p3002_p9 }
 0x1fd   : > { %2283 = dma.done.wait (!%p1881_p4), %s1548_s20, 4096  }
 0x1fe   : > { %2285 = vsyncadd (!%p1881_p4), %s1548_s20, 4294963200  ;;  %s22_s25 = sadd.s32 1, %s2340_s25   ;;  %s3004_s28 = sld [smem:[#allocation13_spill]] }
 0x1ff   : > { %p2892_p1 = scmp.ge.s32.totalorder %s22_s25, 14   ;;  %s3005_s14 = sld [smem:[#allocation24_spill]] }
 0x200   : > { %s3006_s21 = sld [smem:[#allocation14_spill]]  ;;  %s3007_s17 = sld [smem:[#allocation22_spill]] }
 0x201   : > { %s3008_s23 = sld [smem:[#allocation15_spill]]  ;;  %s3009_s20 = sld [smem:[#allocation23_spill]] }
 0x202   : > { %s3010_s8 = sld [smem:[#allocation18_spill]]  ;;  %s3011_s22 = sld [smem:[#allocation19_spill]] }
 0x203   : > { %s3012_s30 = sld [smem:[#allocation20_spill]]  ;;  %s3013_s24 = sld [smem:[#allocation21_spill]] }
 0x204   : > { %s3014_s12 = smov %s2292_s13  ;;  %s3015_s13 = smov %s3004_s28 }
 0x205   : > { %s3016_s15 = smov %s2304_s16  ;;  %s3018_s18 = smov %s2316_s19 }
 0x206   : > { %s3017_s16 = smov %s3006_s21  ;;  %21 = sbr.rel (!%p2892_p1) target bundleno = 15 (0xf), region = 109 }
 0x207   : > { %s3019_s19 = smov %s3008_s23 }
 0x208   : > { %s3020_s21 = smov %s3010_s8 }
 0x209   : > { %s3021_s23 = smov %s3012_s30 }
 0x20d   :  { %1553 = vsyncpa [#allocation4], 1 }
 0x20e   :  { %1555 = vsyncpa [#allocation4 + $0x1], 1 }
 0x20f   :  { %1556 = vsyncpa [#allocation7], 1 }
 0x210   :  { %1558 = vsyncpa [#allocation7 + $0x1], 1 }
 0x211   :  { %1559 = vsyncpa [#allocation5], 1 }
 0x212   :  { %1561 = vsyncpa [#allocation5 + $0x1], 1 }

</bundles_post_ra>
